<compile_context>
chip_gen: v7x
topology: tpu7x:2x2x1
jax: 0.10.0
libtpu: 0.0.40
codegen_flags: <defaults>
</compile_context>

<pallas_src>
import jax
import jax.numpy as jnp
from jax.experimental import pallas as pl
from jax.experimental.pallas import tpu as pltpu

LANE = 128
NEG_BIG = -1e30  # padded-logit bias: exp(z - m) underflows to exactly 0


def segment_kernel(x_ref,
                   w1_ref, b1_ref,
                   w2_ref, b2_ref,
                   w3_ref, b3_ref,
                   o_ref):
    x = x_ref[...]  # (tm, F0) bf16

    # layer 1: fused Linear(+bias)+BN -> ReLU
    h = jnp.dot(x, w1_ref[...], preferred_element_type=jnp.float32) + b1_ref[...]
    h = jnp.maximum(h, 0.0)

    # layer 2: fused Linear(+bias)+BN -> ReLU
    h = jnp.dot(h.astype(jnp.bfloat16), w2_ref[...],
                preferred_element_type=jnp.float32) + b2_ref[...]
    h = jnp.maximum(h, 0.0)

    # classifier head (padded to 128 lanes): fused Linear(+bias)+BN
    z = jnp.dot(h.astype(jnp.bfloat16), w3_ref[...],
                preferred_element_type=jnp.float32) + b3_ref[...]

    # LogSoftmax(dim=1); padded columns carry -1e30 bias so they contribute 0.
    m = jnp.max(z, axis=-1, keepdims=True)
    lse = m + jnp.log(jnp.sum(jnp.exp(z - m), axis=-1, keepdims=True))
    o_ref[...] = z - lse


def fold_and_pad(layer_params, lane=LANE):
    """Fold Linear bias + eval-mode BN affine into (W', b'); pad head to lane width.

    Returns (ws_bf16, bs_f32, out_dim, out_pad).
    """
    fused = []
    for (w, b, s, t) in layer_params:
        wf = (w * s).astype(jnp.float32)          # (kin, kout) * (1, kout)
        bf = (b * s + t).astype(jnp.float32)      # (1, kout)
        fused.append((wf, bf))

    out_dim = fused[-1][0].shape[1]
    out_pad = max(lane, ((out_dim + lane - 1) // lane) * lane)
    pad = out_pad - out_dim
    w3, b3 = fused[-1]
    if pad:
        w3 = jnp.concatenate([w3, jnp.zeros((w3.shape[0], pad), jnp.float32)], axis=1)
        b3 = jnp.concatenate([b3, jnp.full((1, pad), NEG_BIG, jnp.float32)], axis=1)
    fused[-1] = (w3, b3)

    ws = [w.astype(jnp.bfloat16) for (w, _) in fused]
    bs = [b for (_, b) in fused]
    return ws, bs, out_dim, out_pad


def sketchgnn_classifier_forward(x, layer_params, *, tm=2048):
    """x: (M, F) float32. layer_params: list of (W, b, bn_scale, bn_shift)."""
    M, F0 = x.shape
    ws, bs, out_dim, out_pad = fold_and_pad(layer_params)

    tm_eff = min(tm, M)
    assert M % tm_eff == 0, "M must be divisible by the row tile"

    x_bf = x.astype(jnp.bfloat16)

    in_specs = [pl.BlockSpec((tm_eff, F0), lambda i: (i, 0))]
    flat_args = [x_bf]
    for w, b in zip(ws, bs):
        kin, kout = w.shape
        in_specs += [pl.BlockSpec((kin, kout), lambda i: (0, 0)),
                     pl.BlockSpec((1, kout), lambda i: (0, 0))]
        flat_args += [w, b]

    flops = 2 * M * sum(w.shape[0] * w.shape[1] for w in ws)
    bytes_accessed = (x_bf.size * 2 + M * out_pad * 4
                      + sum(w.size * 2 for w in ws)
                      + sum(b.size * 4 for b in bs))
    cost = pl.CostEstimate(flops=flops,
                           transcendentals=M * (out_pad + 1),
                           bytes_accessed=bytes_accessed)

    out_padded = pl.pallas_call(
        segment_kernel,
        out_shape=jax.ShapeDtypeStruct((M, out_pad), jnp.float32),
        grid_spec=pltpu.PrefetchScalarGridSpec(
            num_scalar_prefetch=0,
            grid=(M // tm_eff,),
            in_specs=in_specs,
            out_specs=pl.BlockSpec((tm_eff, out_pad), lambda i: (i, 0)),
        ),
        compiler_params=pltpu.CompilerParams(
            dimension_semantics=("parallel",)),
        cost_estimate=cost,
    )(*flat_args)

    return out_padded[:, :out_dim]


def make_layer_params(key, dims, out_segment, eps=1e-5):
    """Deterministic init of Linear + BatchNorm1d (eval mode) parameters."""
    all_dims = list(dims) + [out_segment]
    params = []
    for i in range(1, len(all_dims)):
        kin, kout = all_dims[i - 1], all_dims[i]
        key, kw, kb, kg, kbt, km, kv = jax.random.split(key, 7)
        bound = 1.0 / jnp.sqrt(kin)
        w = jax.random.uniform(kw, (kin, kout), jnp.float32, -bound, bound)
        b = jax.random.uniform(kb, (1, kout), jnp.float32, -bound, bound)
        # BatchNorm1d (inference): gamma, beta, running_mean, running_var
        gamma = 1.0 + 0.1 * jax.random.normal(kg, (1, kout), jnp.float32)
        beta = 0.1 * jax.random.normal(kbt, (1, kout), jnp.float32)
        rmean = 0.1 * jax.random.normal(km, (1, kout), jnp.float32)
        rvar = jnp.abs(jax.random.normal(kv, (1, kout), jnp.float32)) + 0.5
        scale = gamma / jnp.sqrt(rvar + eps)
        shift = beta - rmean * scale
        params.append((w, b, scale, shift))
    return params


def reference_forward_f32(x, layer_params):
    """Pure-f32 JAX reference of the module semantics."""
    h = x
    n = len(layer_params)
    for idx, (w, b, s, t) in enumerate(layer_params):
        h = jnp.dot(h, w) + b
        h = h * s + t
        if idx < n - 1:
            h = jnp.maximum(h, 0.0)
    return jax.nn.log_softmax(h, axis=1)


def reference_forward_matched(x, layer_params):
    """Reference with the same fold / pad / bf16-matmul numerics as the kernel."""
    ws, bs, out_dim, _ = fold_and_pad(layer_params)
    h = x.astype(jnp.bfloat16).astype(jnp.float32)
    n = len(ws)
    for idx, (w, b) in enumerate(zip(ws, bs)):
        h = jnp.dot(h, w.astype(jnp.float32),
                    preferred_element_type=jnp.float32) + b
        if idx < n - 1:
            h = jnp.maximum(h, 0.0)
            h = h.astype(jnp.bfloat16).astype(jnp.float32)
    return jax.nn.log_softmax(h, axis=1)[:, :out_dim]


if __name__ == "__main__":
    # Small synthetic config:
    #   opt.mlp_segment = [32, 64, 32], opt.out_segment = 10
    #   B = 2 sketches, N = 64 points each  ->  x: (B*N, 32)
    mlp_segment = [32, 64, 32]
    out_segment = 10
    B, N = 2, 64
    M = B * N

    key = jax.random.PRNGKey(0)
    key_x, key_p = jax.random.split(key)
    x = jax.random.normal(key_x, (M, mlp_segment[0]), jnp.float32)
    layer_params = make_layer_params(key_p, mlp_segment, out_segment)

    out = sketchgnn_classifier_forward(x, layer_params, tm=2048)
    out = jax.block_until_ready(out)
    assert out.shape == (M, out_segment)

    # Tight check against a reference matching the kernel's bf16-matmul numerics.
    ref_matched = reference_forward_matched(x, layer_params)
    assert jnp.allclose(out, ref_matched, atol=5e-3, rtol=5e-3), \
        "mismatch vs bf16-matched reference"

    # Loose semantic check against the pure-f32 PyTorch-equivalent forward.
    ref_f32 = reference_forward_f32(x, layer_params)
    assert jnp.allclose(out, ref_f32, atol=1e-1, rtol=5e-2), \
        "mismatch vs f32 reference"

    print("KERNEL_OK")
</pallas_src>

<mosaic_0001>
module attributes {stable_mosaic.version = 11 : i64} {
  func.func @segment_kernel(%arg0: i32, %arg1: memref<128x32xbf16, #tpu.memory_space<vmem>>, %arg2: memref<32x64xbf16, #tpu.memory_space<vmem>>, %arg3: memref<1x64xf32, #tpu.memory_space<vmem>>, %arg4: memref<64x32xbf16, #tpu.memory_space<vmem>>, %arg5: memref<1x32xf32, #tpu.memory_space<vmem>>, %arg6: memref<32x128xbf16, #tpu.memory_space<vmem>>, %arg7: memref<1x128xf32, #tpu.memory_space<vmem>>, %arg8: memref<128x128xf32, #tpu.memory_space<vmem>>) attributes {dimension_semantics = [#tpu.dimension_semantics<parallel>], iteration_bounds = array<i64: 1>, scalar_prefetch = 0 : i64, scratch_operands = 0 : i64, tpu.core_type = #tpu.core_type<tc>, window_params = [{transform_indices = @transform_0, window_bounds = array<i64: 128, 32>}, {pipeline_mode = #tpu.pipeline_mode<synchronous>, transform_indices = @transform_1, window_bounds = array<i64: 32, 64>}, {pipeline_mode = #tpu.pipeline_mode<synchronous>, transform_indices = @transform_2, window_bounds = array<i64: 1, 64>}, {pipeline_mode = #tpu.pipeline_mode<synchronous>, transform_indices = @transform_3, window_bounds = array<i64: 64, 32>}, {pipeline_mode = #tpu.pipeline_mode<synchronous>, transform_indices = @transform_4, window_bounds = array<i64: 1, 32>}, {pipeline_mode = #tpu.pipeline_mode<synchronous>, transform_indices = @transform_5, window_bounds = array<i64: 32, 128>}, {pipeline_mode = #tpu.pipeline_mode<synchronous>, transform_indices = @transform_6, window_bounds = array<i64: 1, 128>}, {transform_indices = @transform_7, window_bounds = array<i64: 128, 128>}]} {
    %c0 = arith.constant 0 : index
    %c0_0 = arith.constant 0 : index
    %0 = vector.load %arg1[%c0, %c0_0] : memref<128x32xbf16, #tpu.memory_space<vmem>>, vector<128x32xbf16>
    %c0_1 = arith.constant 0 : index
    %c0_2 = arith.constant 0 : index
    %1 = vector.load %arg2[%c0_1, %c0_2] : memref<32x64xbf16, #tpu.memory_space<vmem>>, vector<32x64xbf16>
    %cst = arith.constant dense<0.000000e+00> : vector<128x64xf32>
    %2 = tpu.matmul %0, %1, %cst {dimension_numbers = #tpu.dot_dimension_numbers<[1], [0], [0], [1], [0, 0, 1, 1], [], []>} : vector<128x32xbf16>, vector<32x64xbf16>, vector<128x64xf32> -> vector<128x64xf32>
    %c0_3 = arith.constant 0 : index
    %c0_4 = arith.constant 0 : index
    %3 = vector.load %arg3[%c0_3, %c0_4] : memref<1x64xf32, #tpu.memory_space<vmem>>, vector<1x64xf32>
    %4 = vector.broadcast %3 : vector<1x64xf32> to vector<128x64xf32>
    %5 = arith.addf %2, %4 : vector<128x64xf32>
    %cst_5 = arith.constant 0.000000e+00 : f32
    %6 = vector.broadcast %cst_5 : f32 to vector<128x64xf32>
    %7 = arith.maximumf %5, %6 : vector<128x64xf32>
    %8 = arith.truncf %7 : vector<128x64xf32> to vector<128x64xbf16>
    %c0_6 = arith.constant 0 : index
    %c0_7 = arith.constant 0 : index
    %9 = vector.load %arg4[%c0_6, %c0_7] : memref<64x32xbf16, #tpu.memory_space<vmem>>, vector<64x32xbf16>
    %cst_8 = arith.constant dense<0.000000e+00> : vector<128x32xf32>
    %10 = tpu.matmul %8, %9, %cst_8 {dimension_numbers = #tpu.dot_dimension_numbers<[1], [0], [0], [1], [0, 0, 1, 1], [], []>} : vector<128x64xbf16>, vector<64x32xbf16>, vector<128x32xf32> -> vector<128x32xf32>
    %c0_9 = arith.constant 0 : index
    %c0_10 = arith.constant 0 : index
    %11 = vector.load %arg5[%c0_9, %c0_10] : memref<1x32xf32, #tpu.memory_space<vmem>>, vector<1x32xf32>
    %12 = vector.broadcast %11 : vector<1x32xf32> to vector<128x32xf32>
    %13 = arith.addf %10, %12 : vector<128x32xf32>
    %cst_11 = arith.constant 0.000000e+00 : f32
    %14 = vector.broadcast %cst_11 : f32 to vector<128x32xf32>
    %15 = arith.maximumf %13, %14 : vector<128x32xf32>
    %16 = arith.truncf %15 : vector<128x32xf32> to vector<128x32xbf16>
    %c0_12 = arith.constant 0 : index
    %c0_13 = arith.constant 0 : index
    %17 = vector.load %arg6[%c0_12, %c0_13] : memref<32x128xbf16, #tpu.memory_space<vmem>>, vector<32x128xbf16>
    %cst_14 = arith.constant dense<0.000000e+00> : vector<128x128xf32>
    %18 = tpu.matmul %16, %17, %cst_14 {dimension_numbers = #tpu.dot_dimension_numbers<[1], [0], [0], [1], [0, 0, 1, 1], [], []>} : vector<128x32xbf16>, vector<32x128xbf16>, vector<128x128xf32> -> vector<128x128xf32>
    %c0_15 = arith.constant 0 : index
    %c0_16 = arith.constant 0 : index
    %19 = vector.load %arg7[%c0_15, %c0_16] : memref<1x128xf32, #tpu.memory_space<vmem>>, vector<1x128xf32>
    %20 = vector.broadcast %19 : vector<1x128xf32> to vector<128x128xf32>
    %21 = arith.addf %18, %20 : vector<128x128xf32>
    %cst_17 = arith.constant dense<0xFF800000> : vector<128xf32>
    %22 = vector.multi_reduction <maximumf>, %21, %cst_17 [1] : vector<128x128xf32> to vector<128xf32>
    %23 = vector.shape_cast %22 : vector<128xf32> to vector<128x1xf32>
    %24 = vector.broadcast %23 : vector<128x1xf32> to vector<128x128xf32>
    %25 = arith.subf %21, %24 : vector<128x128xf32>
    %26 = math.exp %25 : vector<128x128xf32>
    %cst_18 = arith.constant dense<0.000000e+00> : vector<128xf32>
    %27 = vector.multi_reduction <add>, %26, %cst_18 [1] : vector<128x128xf32> to vector<128xf32>
    %28 = vector.shape_cast %27 : vector<128xf32> to vector<128x1xf32>
    %29 = math.log %28 : vector<128x1xf32>
    %30 = arith.addf %23, %29 : vector<128x1xf32>
    %31 = vector.broadcast %30 : vector<128x1xf32> to vector<128x128xf32>
    %32 = arith.subf %21, %31 : vector<128x128xf32>
    %c0_19 = arith.constant 0 : index
    %c0_20 = arith.constant 0 : index
    %33 = vector.load %arg8[%c0_19, %c0_20] : memref<128x128xf32, #tpu.memory_space<vmem>>, vector<128x128xf32>
    tpu.vector_store %arg8[%c0_19, %c0_20], %32 {strides = array<i32>} : memref<128x128xf32, #tpu.memory_space<vmem>>, vector<128x128xf32>,
    return
  }
  func.func @transform_0(%arg0: i32) -> (i32, i32) {
    %c0_i32 = arith.constant 0 : i32
    %c0_i32_0 = arith.constant 0 : i32
    return %arg0, %c0_i32 : i32, i32
  }
  func.func @transform_1(%arg0: i32) -> (i32, i32) {
    %c0_i32 = arith.constant 0 : i32
    %c0_i32_0 = arith.constant 0 : i32
    %c0_i32_1 = arith.constant 0 : i32
    return %c0_i32, %c0_i32_0 : i32, i32
  }
  func.func @transform_2(%arg0: i32) -> (i32, i32) {
    %c0_i32 = arith.constant 0 : i32
    %c0_i32_0 = arith.constant 0 : i32
    %c0_i32_1 = arith.constant 0 : i32
    return %c0_i32, %c0_i32_0 : i32, i32
  }
  func.func @transform_3(%arg0: i32) -> (i32, i32) {
    %c0_i32 = arith.constant 0 : i32
    %c0_i32_0 = arith.constant 0 : i32
    %c0_i32_1 = arith.constant 0 : i32
    return %c0_i32, %c0_i32_0 : i32, i32
  }
  func.func @transform_4(%arg0: i32) -> (i32, i32) {
    %c0_i32 = arith.constant 0 : i32
    %c0_i32_0 = arith.constant 0 : i32
    %c0_i32_1 = arith.constant 0 : i32
    return %c0_i32, %c0_i32_0 : i32, i32
  }
  func.func @transform_5(%arg0: i32) -> (i32, i32) {
    %c0_i32 = arith.constant 0 : i32
    %c0_i32_0 = arith.constant 0 : i32
    %c0_i32_1 = arith.constant 0 : i32
    return %c0_i32, %c0_i32_0 : i32, i32
  }
  func.func @transform_6(%arg0: i32) -> (i32, i32) {
    %c0_i32 = arith.constant 0 : i32
    %c0_i32_0 = arith.constant 0 : i32
    %c0_i32_1 = arith.constant 0 : i32
    return %c0_i32, %c0_i32_0 : i32, i32
  }
  func.func @transform_7(%arg0: i32) -> (i32, i32) {
    %c0_i32 = arith.constant 0 : i32
    %c0_i32_0 = arith.constant 0 : i32
    return %arg0, %c0_i32 : i32, i32
  }
}

</mosaic_0001>

<bundles_post_ra>
// kernel: tpu_custom_call.1
= control target key start
LH: loop header
LB: loop body
LE: loop exit
PB: predicated region body
PF: predicated region fallthrough
CT: control target
= control target key end

     0   :  { %vm107_vm0 = vcmask 261120   ;;  %s1320_s0 = inlined_call_operand.vmem [shape: bf16[128,32], index: 0, kind: input, shape index: {}]   ;;  %s1321_s1 = inlined_call_operand.vmem [shape: bf16[32,64], index: 1, kind: input, shape index: {}]   ;;  %s1322_s2 = inlined_call_operand.vmem [shape: f32[1,64], index: 2, kind: input, shape index: {}]   ;;  %s1323_s3 = inlined_call_operand.vmem [shape: bf16[64,32], index: 3, kind: input, shape index: {}]   ;;  %s1324_s4 = inlined_call_operand.vmem [shape: f32[1,32], index: 4, kind: input, shape index: {}]   ;;  %s1325_s5 = inlined_call_operand.vmem [shape: bf16[32,128], index: 5, kind: input, shape index: {}]   ;;  %s1326_s6 = inlined_call_operand.vmem [shape: f32[1,128], index: 6, kind: input, shape index: {}]   ;;  %s1327_s7 = inlined_call_operand.hbm [shape: f32[128,128], index: 7, kind: output, shape index: {}]  }
   0x1   :  { %v936_v0 = vld [vmem:[%s1321_s1] sm:$0xff]   ;;  %v937_v1 = vld [vmem:[%s1321_s1 + $0x8] sm:$0xff]   ;;  %v940_v4 = vld [vmem:[%s1320_s0 + $0x10] sm:$0xff]  }
   0x2   :  { %865 = vmatprep.subr.bf16.mxu0 %v936_v0  ;;  %v938_v2 = vld [vmem:[%s1320_s0] sm:$0xff]   ;;  %929 = vmatprep.subr.bf16.mxu1 %v936_v0  ;;  %v939_v3 = vld [vmem:[%s1320_s0 + $0x8] sm:$0xff]   ;;  %v944_v7 = vld [vmem:[%s1320_s0 + $0x30] sm:$0xff]  }
   0x3   :  { %866 = vmatpush3.bf16.msra.mxu0 %v936_v0  ;;  %931 = vmatpush3.bf16.msra.mxu1 %v936_v0  ;;  %v942_v5 = vld [vmem:[%s1320_s0 + $0x20] sm:$0xff]   ;;  %v943_v6 = vld [vmem:[%s1320_s0 + $0x28] sm:$0xff]   ;;  %v941_v10 = vld [vmem:[%s1320_s0 + $0x18] sm:$0xff]  }
   0x4   :  { %867 = vmatprep.subr.bf16.mxu0 %v937_v1  ;;  %869 = vmatprep.mubr.msk.bf16.mxu0 %vm107_vm0, %v938_v2  ;;  %v946_v8 = vld [vmem:[%s1323_s3] sm:$0xff]   ;;  %v947_v9 = vld [vmem:[%s1323_s3 + $0x8] sm:$0xff]   ;;  %v945_v11 = vld [vmem:[%s1320_s0 + $0x38] sm:$0xff]  }
   0x5   :  { %930 = vmatprep.subr.bf16.mxu1 %v937_v1  ;;  %877 = vmatprep.mubr.msk.bf16.mxu1 %vm107_vm0, %v942_v5 }
   0x7   :  { %868 = vmatpush3.bf16.msra.mxu0 %v937_v1  ;;  %932 = vmatpush3.bf16.msra.mxu1 %v937_v1 }
   0x8   :  { %885 = vmatprep.subr.bf16.mxu1 %v946_v8 }
   0xa   :  { %870 = vmatmul.mubr.msk.bf16.vlgmr.msra.gmra.mrb[0].mxu0 %vm107_vm0, %v939_v3  ;;  %878 = vmatmul.mubr.msk.bf16.vlgmr.msra.gmra.mrb[0].mxu1 %vm107_vm0, %v943_v6 }
   0xb   :  { %873 = vmatprep.mubr.msk.bf16.mxu0 %vm107_vm0, %v940_v4  ;;  %881 = vmatprep.mubr.msk.bf16.mxu1 %vm107_vm0, %v944_v7 }
   0xc   :  { %886 = vmatpush3.bf16.msra.mxu1 %v946_v8 }
   0xd   :  { %887 = vmatprep.subr.bf16.mxu1 %v947_v9 }
   0xe   :  { %12 = vsyncpa [#allocation3], 0  ;;  %v948_v12 = vld [vmem:[%s1323_s3 + $0x10] sm:$0xff]   ;;  %v949_v13 = vld [vmem:[%s1323_s3 + $0x18] sm:$0xff]   ;;  %vm292_vm1 = vcmask 523264  }
   0xf   :  { %v950_v14 = vld [vmem:[%s1325_s5] sm:$0xff]   ;;  %v951_v8 = vld [vmem:[%s1325_s5 + $0x8] sm:$0xff]  }
  0x10   :  { %888 = vmatpush3.bf16.msra.mxu1 %v947_v9  ;;  %909 = vmatprep.subr.bf16.mxu0 %v950_v14  ;;  %v790_v15 = vld [vmem:[%s1322_s2] ss:$0 sm:$0xff] }
  0x11   :  { %889 = vmatprep.subr.bf16.mxu1 %v948_v12  ;;  %910 = vmatpush3.bf16.msra.mxu0 %v950_v14  ;;  %v809_v9 = vld [vmem:[%s1324_s4] ss:$0 sm:$0xff] }
  0x12   :  { %874 = vmatmul.mubr.msk.bf16.gmra.mrb[4].mxu0 %vm107_vm0, %v941_v10  ;;  %882 = vmatmul.mubr.msk.bf16.gmra.mrb[4].mxu1 %vm107_vm0, %v945_v11 }
  0x13   :  { %911 = vmatprep.subr.bf16.mxu0 %v951_v8 }
  0x14   :  { %890 = vmatpush3.bf16.msra.mxu1 %v948_v12 }
  0x15   :  { %891 = vmatprep.subr.bf16.mxu1 %v949_v13  ;;  %912 = vmatpush3.bf16.msra.mxu0 %v951_v8 }
  0x18   :  { %892 = vmatpush3.bf16.msra.mxu1 %v949_v13 }
  0xdd   :  { %v871_v16 = vpop.f32.mrb[0].mxu0  ;;  %v879_v17 = vpop.f32.mrb[0].mxu1 }
  0xde   :  { %v175_v18 = vadd.f32 %v871_v16, %v790_v15  ;;  %v166_v19 = vpop.f32.mrb[1].mxu0  ;;  %v207_v20 = vadd.f32 %v879_v17, %v790_v15  ;;  %v198_v21 = vpop.f32.mrb[1].mxu1 }
  0xdf   :  { %v167_v22 = vadd.f32 %v790_v15, %v166_v19  ;;  %v872_v23 = vpop.f32.mrb[2].mxu0  ;;  %v199_v24 = vadd.f32 %v790_v15, %v198_v21  ;;  %v880_v25 = vpop.f32.mrb[2].mxu1 }
  0xe0   :  { %v178_v26 = vadd.f32 %v872_v23, %v790_v15  ;;  %v169_v27 = vpop.f32.mrb[3].mxu0  ;;  %v239_v28 = vmax.f32 %v207_v20, 0.0  ;;  %v210_v29 = vadd.f32 %v880_v25, %v790_v15  ;;  %v201_v30 = vpop.f32.mrb[3].mxu1  ;;  %v231_v34 = vmax.f32 %v175_v18, 0.0 }
  0xe1   :  { %v170_v31 = vadd.f32 %v790_v15, %v169_v27  ;;  %v237_v32 = vmax.f32 %v199_v24, 0.0  ;;  %v202_v33 = vadd.f32 %v790_v15, %v201_v30  ;;  %v229_v37 = vmax.f32 %v167_v22, 0.0 }
  0xe2   :  { %v232_v35 = vmax.f32 %v178_v26, 0.0  ;;  %v240_v36 = vmax.f32 %v210_v29, 0.0 }
  0xe3   :  { %v230_v38 = vmax.f32 %v170_v31, 0.0  ;;  %v238_v39 = vmax.f32 %v202_v33, 0.0 }
  0xe4   :  { %v246_v40 = vpack.c.bf16 %v232_v35, %v231_v34  ;;  %v250_v41 = vpack.c.bf16 %v240_v36, %v239_v28 }
  0xe5   :  { %v245_v42 = vpack.c.bf16 %v230_v38, %v229_v37  ;;  %v875_v43 = vpop.f32.mrb[4].mxu0  ;;  %v249_v44 = vpack.c.bf16 %v238_v39, %v237_v32  ;;  %v883_v45 = vpop.f32.mrb[4].mxu1 }
  0xe6   :  { %v191_v46 = vadd.f32 %v875_v43, %v790_v15  ;;  %v182_v47 = vpop.f32.mrb[5].mxu0  ;;  %v223_v48 = vadd.f32 %v883_v45, %v790_v15  ;;  %v214_v49 = vpop.f32.mrb[5].mxu1 }
  0xe7   :  { %v183_v50 = vadd.f32 %v790_v15, %v182_v47  ;;  %v876_v51 = vpop.f32.mrb[6].mxu0  ;;  %893 = vmatprep.mubr.msk.bf16.mxu1 %vm292_vm1, %v245_v42  ;;  %v215_v52 = vadd.f32 %v790_v15, %v214_v49  ;;  %v884_v53 = vpop.f32.mrb[6].mxu1 }
  0xe8   :  { %v235_v54 = vmax.f32 %v191_v46, 0.0  ;;  %v194_v55 = vadd.f32 %v876_v51, %v790_v15  ;;  %v185_v56 = vpop.f32.mrb[7].mxu0  ;;  %894 = vmatmul.mubr.msk.bf16.vlgmr.msra.gmra.mrb[8].mxu1 %vm292_vm1, %v246_v40  ;;  %v243_v57 = vmax.f32 %v223_v48, 0.0  ;;  %v226_v58 = vadd.f32 %v884_v53, %v790_v15  ;;  %v217_v59 = vpop.f32.mrb[7].mxu1 }
  0xe9   :  { %v186_v60 = vadd.f32 %v790_v15, %v185_v56  ;;  %v241_v61 = vmax.f32 %v215_v52, 0.0  ;;  %v218_v62 = vadd.f32 %v790_v15, %v217_v59  ;;  %v233_v1 = vmax.f32 %v183_v50, 0.0 }
  0xea   :  { %v236_v63 = vmax.f32 %v194_v55, 0.0  ;;  %v244_v0 = vmax.f32 %v226_v58, 0.0 }
  0xeb   :  { %v234_v2 = vmax.f32 %v186_v60, 0.0  ;;  %v242_v3 = vmax.f32 %v218_v62, 0.0 }
  0xec   :  { %v248_v4 = vpack.c.bf16 %v236_v63, %v235_v54  ;;  %v252_v5 = vpack.c.bf16 %v244_v0, %v243_v57 }
  0xed   :  { %v247_v6 = vpack.c.bf16 %v234_v2, %v233_v1  ;;  %v251_v7 = vpack.c.bf16 %v242_v3, %v241_v61  ;;  %v822_v2 = vld [vmem:[%s1326_s6] ss:$0 sm:$0xff]  ;;  %s1040_s6 = smov [#allocation2]  }
  0xee   :  { %s779_s10 = sshll.u32 %s1040_s6, 4  ;;  %s780_s10 = int_to_ptr.vmem [resolvable:$true] %s779_s10 }
  0xef   :  { %897 = vmatprep.mubr.msk.bf16.mxu1 %vm292_vm1, %v247_v6  ;;  %s1016_s1 = scalar_lea.vmem %s780_s10, 2048  ;;  %p1021_p1 = scmp.lt.s32.totalorder %s780_s10, %s780_s10 }
  0xf0   :  { %898 = vmatmul.mubr.msk.bf16.gmra.mrb[12].mxu1 %vm292_vm1, %v248_v4  ;;  %p1017_p0 = scmp.ne.s32.totalorder %s780_s10, %s1016_s1  ;;  %p1022_p2 = scmp.lt.s32.totalorder %s1016_s1, %s1016_s1 }
  0xf1   :  { %901 = vmatprep.mubr.msk.bf16.mxu1 %vm292_vm1, %v249_v44 }
  0xf2   :  { %p1023_p3 = por %p1022_p2, %p1021_p1 }
  0xf4   :  { %p1024_p4 = pnand %p1023_p3, %p1017_p0 }
  0xf8   :  { %902 = vmatmul.mubr.msk.bf16.gmra.mrb[16].mxu1 %vm292_vm1, %v250_v41 }
  0xf9   :  { %905 = vmatprep.mubr.msk.bf16.mxu1 %vm292_vm1, %v251_v7 }
 0x100   :  { %906 = vmatmul.mubr.msk.bf16.gmra.mrb[20].mxu1 %vm292_vm1, %v252_v5 }
 0x1bb   :  { %v895_v10 = vpop.f32.mrb[8].mxu1 }
 0x1bc   :  { %v360_v11 = vadd.f32 %v895_v10, %v809_v9  ;;  %v351_v12 = vpop.f32.mrb[9].mxu1 }
 0x1bd   :  { %v352_v13 = vadd.f32 %v809_v9, %v351_v12  ;;  %v896_v14 = vpop.f32.mrb[10].mxu1 }
 0x1be   :  { %v363_v15 = vadd.f32 %v896_v14, %v809_v9  ;;  %v354_v16 = vpop.f32.mrb[11].mxu1  ;;  %v416_v18 = vmax.f32 %v360_v11, 0.0 }
 0x1bf   :  { %v355_v17 = vadd.f32 %v809_v9, %v354_v16  ;;  %v414_v20 = vmax.f32 %v352_v13, 0.0 }
 0x1c0   :  { %v417_v19 = vmax.f32 %v363_v15, 0.0 }
 0x1c1   :  { %v415_v21 = vmax.f32 %v355_v17, 0.0 }
 0x1c2   :  { %v431_v22 = vpack.c.bf16 %v417_v19, %v416_v18 }
 0x1c3   :  { %v430_v23 = vpack.c.bf16 %v415_v21, %v414_v20  ;;  %v899_v24 = vpop.f32.mrb[12].mxu1 }
 0x1c4   :  { %v376_v25 = vadd.f32 %v899_v24, %v809_v9  ;;  %v367_v26 = vpop.f32.mrb[13].mxu1 }
 0x1c5   :  { %v368_v27 = vadd.f32 %v809_v9, %v367_v26  ;;  %v900_v28 = vpop.f32.mrb[14].mxu1  ;;  %913 = vmatprep.mubr.msk.bf16.mxu0 %vm107_vm0, %v430_v23 }
 0x1c6   :  { %v379_v29 = vadd.f32 %v900_v28, %v809_v9  ;;  %v370_v30 = vpop.f32.mrb[15].mxu1  ;;  %914 = vmatmul.mubr.msk.bf16.vlgmr.msra.gmra.mrb[8].mxu0 %vm107_vm0, %v431_v22  ;;  %v420_v32 = vmax.f32 %v376_v25, 0.0 }
 0x1c7   :  { %v371_v31 = vadd.f32 %v809_v9, %v370_v30  ;;  %v418_v34 = vmax.f32 %v368_v27, 0.0 }
 0x1c8   :  { %v421_v33 = vmax.f32 %v379_v29, 0.0 }
 0x1c9   :  { %v419_v35 = vmax.f32 %v371_v31, 0.0 }
 0x1ca   :  { %v433_v36 = vpack.c.bf16 %v421_v33, %v420_v32 }
 0x1cb   :  { %v432_v37 = vpack.c.bf16 %v419_v35, %v418_v34  ;;  %v903_v38 = vpop.f32.mrb[16].mxu1 }
 0x1cc   :  { %v392_v39 = vadd.f32 %v903_v38, %v809_v9  ;;  %v383_v40 = vpop.f32.mrb[17].mxu1 }
 0x1cd   :  { %v384_v41 = vadd.f32 %v809_v9, %v383_v40  ;;  %v904_v42 = vpop.f32.mrb[18].mxu1  ;;  %917 = vmatprep.mubr.msk.bf16.mxu0 %vm107_vm0, %v432_v37 }
 0x1ce   :  { %v395_v43 = vadd.f32 %v904_v42, %v809_v9  ;;  %v386_v44 = vpop.f32.mrb[19].mxu1  ;;  %918 = vmatmul.mubr.msk.bf16.gmra.mrb[12].mxu0 %vm107_vm0, %v433_v36  ;;  %v424_v46 = vmax.f32 %v392_v39, 0.0 }
 0x1cf   :  { %v387_v45 = vadd.f32 %v809_v9, %v386_v44  ;;  %v422_v48 = vmax.f32 %v384_v41, 0.0 }
 0x1d0   :  { %v425_v47 = vmax.f32 %v395_v43, 0.0 }
 0x1d1   :  { %v423_v49 = vmax.f32 %v387_v45, 0.0 }
 0x1d2   :  { %v435_v50 = vpack.c.bf16 %v425_v47, %v424_v46 }
 0x1d3   :  { %v434_v51 = vpack.c.bf16 %v423_v49, %v422_v48  ;;  %v907_v52 = vpop.f32.mrb[20].mxu1 }
 0x1d4   :  { %v408_v53 = vadd.f32 %v907_v52, %v809_v9  ;;  %v399_v54 = vpop.f32.mrb[21].mxu1 }
 0x1d5   :  { %v400_v55 = vadd.f32 %v809_v9, %v399_v54  ;;  %v908_v56 = vpop.f32.mrb[22].mxu1  ;;  %921 = vmatprep.mubr.msk.bf16.mxu0 %vm107_vm0, %v434_v51 }
 0x1d6   :  { %v411_v57 = vadd.f32 %v908_v56, %v809_v9  ;;  %v402_v58 = vpop.f32.mrb[23].mxu1  ;;  %922 = vmatmul.mubr.msk.bf16.gmra.mrb[16].mxu0 %vm107_vm0, %v435_v50  ;;  %v428_v60 = vmax.f32 %v408_v53, 0.0 }
 0x1d7   :  { %v403_v59 = vadd.f32 %v809_v9, %v402_v58  ;;  %v426_v62 = vmax.f32 %v400_v55, 0.0 }
 0x1d8   :  { %v429_v61 = vmax.f32 %v411_v57, 0.0 }
 0x1d9   :  { %v427_v63 = vmax.f32 %v403_v59, 0.0 }
 0x1da   :  { %v437_v0 = vpack.c.bf16 %v429_v61, %v428_v60 }
 0x1db   :  { %v436_v1 = vpack.c.bf16 %v427_v63, %v426_v62 }
 0x1dd   :  { %925 = vmatprep.mubr.msk.bf16.mxu0 %vm107_vm0, %v436_v1 }
 0x1de   :  { %926 = vmatmul.mubr.msk.bf16.gmra.mrb[20].mxu0 %vm107_vm0, %v437_v0 }
 0x299   :  { %v915_v3 = vpop.f32.mrb[8].mxu0 }
 0x29a   :  { %v1164_v4 = vadd.f32 %v915_v3, %v822_v2  ;;  %v519_v5 = vpop.f32.mrb[9].mxu0 }
 0x29b   :  { %v1166_v6 = vadd.f32 %v822_v2, %v519_v5  ;;  %v916_v7 = vpop.f32.mrb[10].mxu0 }
 0x29c   :  { %586 = vmax.xlane.f32.xlu1 %v1164_v4  ;;  %v522_v8 = vpop.f32.mrb[11].mxu0  ;;  %v1170_v9 = vadd.f32 %v916_v7, %v822_v2 }
 0x29d   :  { %582 = vmax.xlane.f32.xlu0 %v1166_v6  ;;  %v1172_v10 = vadd.f32 %v822_v2, %v522_v8 }
 0x2a0   :  { %588 = vmax.xlane.f32.xlu1 %v1170_v9 }
 0x2a1   :  { %v919_v11 = vpop.f32.mrb[12].mxu0  ;;  %584 = vmax.xlane.f32.xlu0 %v1172_v10 }
 0x2a2   :  { %v1176_v12 = vadd.f32 %v919_v11, %v822_v2  ;;  %v535_v13 = vpop.f32.mrb[13].mxu0 }
 0x2a3   :  { %v920_v14 = vpop.f32.mrb[14].mxu0  ;;  %v1182_v17 = vadd.f32 %v822_v2, %v535_v13 }
 0x2a4   :  { %v1178_v15 = vadd.f32 %v920_v14, %v822_v2  ;;  %v538_v16 = vpop.f32.mrb[15].mxu0 }
 0x2a5   :  { %594 = vmax.xlane.f32.xlu0 %v1176_v12  ;;  %v1184_v18 = vadd.f32 %v822_v2, %v538_v16 }
 0x2a6   :  { %596 = vmax.xlane.f32.xlu1 %v1178_v15 }
 0x2a9   :  { %v923_v19 = vpop.f32.mrb[16].mxu0  ;;  %590 = vmax.xlane.f32.xlu0 %v1182_v17 }
 0x2aa   :  { %v1187_v20 = vadd.f32 %v923_v19, %v822_v2  ;;  %v551_v21 = vpop.f32.mrb[17].mxu0  ;;  %592 = vmax.xlane.f32.xlu1 %v1184_v18 }
 0x2ab   :  { %v924_v22 = vpop.f32.mrb[18].mxu0  ;;  %v1194_v25 = vadd.f32 %v822_v2, %v551_v21 }
 0x2ac   :  { %v1190_v23 = vadd.f32 %v924_v22, %v822_v2  ;;  %v554_v24 = vpop.f32.mrb[19].mxu0 }
 0x2ad   :  { %602 = vmax.xlane.f32.xlu0 %v1187_v20  ;;  %v1196_v26 = vadd.f32 %v822_v2, %v554_v24 }
 0x2ae   :  { %604 = vmax.xlane.f32.xlu1 %v1190_v23 }
 0x2b1   :  { %v927_v27 = vpop.f32.mrb[20].mxu0  ;;  %598 = vmax.xlane.f32.xlu0 %v1194_v25 }
 0x2b2   :  { %v567_v28 = vpop.f32.mrb[21].mxu0  ;;  %600 = vmax.xlane.f32.xlu1 %v1196_v26  ;;  %v1205_v33 = vadd.f32 %v927_v27, %v822_v2 }
 0x2b3   :  { %v1200_v29 = vadd.f32 %v822_v2, %v567_v28  ;;  %v928_v30 = vpop.f32.mrb[22].mxu0 }
 0x2b4   :  { %v570_v31 = vpop.f32.mrb[23].mxu0  ;;  %v1208_v34 = vadd.f32 %v928_v30, %v822_v2 }
 0x2b5   :  { %v1202_v32 = vadd.f32 %v822_v2, %v570_v31  ;;  %606 = vmax.xlane.f32.xlu0 %v1200_v29 }
 0x2b7   :  { %608 = vmax.xlane.f32.xlu1 %v1202_v32 }
 0x2b9   :  { %610 = vmax.xlane.f32.xlu0 %v1205_v33 }
 0x2bb   :  { %612 = vmax.xlane.f32.xlu1 %v1208_v34 }
 0x329   :  { %v1212_v35 = vpop.xlane.xlu1 %586 }
 0x32a   :  { %v616_v36 = vsub.f32 %v1164_v4, %v1212_v35  ;;  %v1216_v37 = vpop.xlane.xlu0 %582 }
 0x32b   :  { %v614_v38 = vsub.f32 %v1166_v6, %v1216_v37 }
 0x32c   :  { %v634_v39 = vmul.f32 1.442695, %v616_v36 }
 0x32d   :  { %v630_v40 = vmul.f32 1.442695, %v614_v38  ;;  %v1220_v41 = vpop.xlane.xlu1 %588 }
 0x32e   :  { %952 = vpow2.f32 %v634_v39  ;;  %v617_v42 = vsub.f32 %v1170_v9, %v1220_v41  ;;  %v1224_v43 = vpop.xlane.xlu0 %584 }
 0x32f   :  { %v615_v44 = vsub.f32 %v1172_v10, %v1224_v43  ;;  %954 = vpow2.f32 %v630_v40 }
 0x330   :  { %v636_v45 = vmul.f32 1.442695, %v617_v42 }
 0x331   :  { %v632_v46 = vmul.f32 1.442695, %v615_v44 }
 0x332   :  { %956 = vpow2.f32 %v636_v45  ;;  %v1228_v47 = vpop.xlane.xlu0 %594 }
 0x333   :  { %v620_v48 = vsub.f32 %v1176_v12, %v1228_v47  ;;  %v1232_v49 = vpop.xlane.xlu1 %596  ;;  %958 = vpow2.f32 %v632_v46 }
 0x334   :  { %v621_v50 = vsub.f32 %v1178_v15, %v1232_v49 }
 0x335   :  { %v642_v51 = vmul.f32 1.442695, %v620_v48 }
 0x336   :  { %v644_v52 = vmul.f32 1.442695, %v621_v50  ;;  %v1236_v53 = vpop.xlane.xlu0 %590 }
 0x337   :  { %960 = vpow2.f32 %v642_v51  ;;  %v618_v54 = vsub.f32 %v1182_v17, %v1236_v53  ;;  %v1240_v55 = vpop.xlane.xlu1 %592 }
 0x338   :  { %v953_v56 = vpop.eup %952  ;;  %v619_v57 = vsub.f32 %v1184_v18, %v1240_v55  ;;  %962 = vpow2.f32 %v644_v52 }
 0x339   :  { %v638_v58 = vmul.f32 1.442695, %v618_v54  ;;  %666 = vadd.xlane.f32.xlu0 %v953_v56  ;;  %v955_v61 = vpop.eup %954 }
 0x33a   :  { %v640_v59 = vmul.f32 1.442695, %v619_v57  ;;  %v1244_v60 = vpop.xlane.xlu0 %602 }
 0x33b   :  { %964 = vpow2.f32 %v638_v58  ;;  %v624_v62 = vsub.f32 %v1187_v20, %v1244_v60  ;;  %v1248_v63 = vpop.xlane.xlu1 %604 }
 0x33c   :  { %v957_v0 = vpop.eup %956  ;;  %v625_v1 = vsub.f32 %v1190_v23, %v1248_v63  ;;  %966 = vpow2.f32 %v640_v59 }
 0x33d   :  { %v650_v2 = vmul.f32 1.442695, %v624_v62  ;;  %668 = vadd.xlane.f32.xlu1 %v957_v0  ;;  %662 = vadd.xlane.f32.xlu0 %v955_v61  ;;  %v959_v11 = vpop.eup %958 }
 0x33e   :  { %v652_v3 = vmul.f32 1.442695, %v625_v1  ;;  %v1252_v5 = vpop.xlane.xlu0 %598 }
 0x33f   :  { %968 = vpow2.f32 %v650_v2  ;;  %v622_v7 = vsub.f32 %v1194_v25, %v1252_v5  ;;  %v1256_v8 = vpop.xlane.xlu1 %600 }
 0x340   :  { %v623_v13 = vsub.f32 %v1196_v26, %v1256_v8  ;;  %970 = vpow2.f32 %v652_v3 }
 0x341   :  { %v961_v14 = vpop.eup %960  ;;  %v646_v16 = vmul.f32 1.442695, %v622_v7  ;;  %664 = vadd.xlane.f32.xlu1 %v959_v11 }
 0x342   :  { %v648_v19 = vmul.f32 1.442695, %v623_v13  ;;  %674 = vadd.xlane.f32.xlu0 %v961_v14  ;;  %v1260_v21 = vpop.xlane.xlu0 %606  ;;  %v963_v24 = vpop.eup %962 }
 0x343   :  { %972 = vpow2.f32 %v646_v16  ;;  %v626_v22 = vsub.f32 %v1200_v29, %v1260_v21 }
 0x344   :  { %v1264_v27 = vpop.xlane.xlu1 %608  ;;  %974 = vpow2.f32 %v648_v19 }
 0x345   :  { %v965_v28 = vpop.eup %964  ;;  %v654_v30 = vmul.f32 1.442695, %v626_v22  ;;  %v627_v31 = vsub.f32 %v1202_v32, %v1264_v27  ;;  %676 = vadd.xlane.f32.xlu1 %v963_v24 }
 0x346   :  { %670 = vadd.xlane.f32.xlu0 %v965_v28  ;;  %v1268_v36 = vpop.xlane.xlu0 %610  ;;  %v967_v40 = vpop.eup %966 }
 0x347   :  { %976 = vpow2.f32 %v654_v30  ;;  %v656_v38 = vmul.f32 1.442695, %v627_v31  ;;  %v628_v39 = vsub.f32 %v1205_v33, %v1268_v36 }
 0x348   :  { %v1272_v42 = vpop.xlane.xlu1 %612 }
 0x349   :  { %v969_v44 = vpop.eup %968  ;;  %978 = vpow2.f32 %v656_v38  ;;  %v658_v45 = vmul.f32 1.442695, %v628_v39  ;;  %v629_v46 = vsub.f32 %v1208_v34, %v1272_v42  ;;  %672 = vadd.xlane.f32.xlu1 %v967_v40 }
 0x34a   :  { %682 = vadd.xlane.f32.xlu0 %v969_v44  ;;  %v971_v50 = vpop.eup %970 }
 0x34b   :  { %980 = vpow2.f32 %v658_v45  ;;  %v660_v48 = vmul.f32 1.442695, %v629_v46 }
 0x34d   :  { %v973_v51 = vpop.eup %972  ;;  %982 = vpow2.f32 %v660_v48  ;;  %684 = vadd.xlane.f32.xlu1 %v971_v50 }
 0x34e   :  { %678 = vadd.xlane.f32.xlu0 %v973_v51  ;;  %v975_v52 = vpop.eup %974 }
 0x351   :  { %v977_v54 = vpop.eup %976  ;;  %680 = vadd.xlane.f32.xlu1 %v975_v52 }
 0x352   :  { %686 = vadd.xlane.f32.xlu0 %v977_v54 }
 0x353   :  { %v979_v56 = vpop.eup %978 }
 0x355   :  { %v981_v57 = vpop.eup %980  ;;  %688 = vadd.xlane.f32.xlu1 %v979_v56 }
 0x356   :  { %690 = vadd.xlane.f32.xlu0 %v981_v57 }
 0x357   :  { %v983_v58 = vpop.eup %982 }
 0x359   :  { %692 = vadd.xlane.f32.xlu1 %v983_v58 }
 0x3c6   :  { %v667_v59 = vpop.xlane.xlu0 %666 }
 0x3c7   :  { %984 = vlog2.f32 %v667_v59 }
 0x3ca   :  { %v669_v61 = vpop.xlane.xlu1 %668  ;;  %v663_v62 = vpop.xlane.xlu0 %662 }
 0x3cb   :  { %986 = vlog2.f32 %v669_v61 }
 0x3cc   :  { %988 = vlog2.f32 %v663_v62 }
 0x3ce   :  { %v665_v0 = vpop.xlane.xlu1 %664 }
 0x3cf   :  { %990 = vlog2.f32 %v665_v0  ;;  %v675_v1 = vpop.xlane.xlu0 %674 }
 0x3d0   :  { %992 = vlog2.f32 %v675_v1 }
 0x3d1   :  { %v985_v2 = vpop.eup %984 }
 0x3d2   :  { %v699_v3 = vmul.f32 0.6931472, %v985_v2  ;;  %v677_v7 = vpop.xlane.xlu1 %676 }
 0x3d3   :  { %994 = vlog2.f32 %v677_v7  ;;  %v671_v11 = vpop.xlane.xlu0 %670 }
 0x3d4   :  { %v728_v13 = vadd.f32 %v699_v3, %v1212_v35  ;;  %996 = vlog2.f32 %v671_v11 }
 0x3d5   :  { %v987_v14 = vpop.eup %986 }
 0x3d6   :  { %v989_v16 = vpop.eup %988  ;;  %v744_v19 = vsub.f32 %v1164_v4, %v728_v13  ;;  %v701_v22 = vmul.f32 0.6931472, %v987_v14  ;;  %v673_v24 = vpop.xlane.xlu1 %672 }
 0x3d7   :  { %v695_v28 = vmul.f32 0.6931472, %v989_v16  ;;  %998 = vlog2.f32 %v673_v24  ;;  %v683_v30 = vpop.xlane.xlu0 %682 }
 0x3d8   :  { %760 = vst [vmem:[#allocation2 + $0x10] sm:$0xff] %v744_v19  ;;  %v729_v31 = vadd.f32 %v701_v22, %v1220_v41  ;;  %1000 = vlog2.f32 %v683_v30 }
 0x3d9   :  { %v991_v38 = vpop.eup %990  ;;  %v726_v39 = vadd.f32 %v695_v28, %v1216_v37 }
 0x3da   :  { %v993_v40 = vpop.eup %992  ;;  %v745_v35 = vsub.f32 %v1170_v9, %v729_v31  ;;  %v697_v44 = vmul.f32 0.6931472, %v991_v38  ;;  %v685_v45 = vpop.xlane.xlu1 %684 }
 0x3db   :  { %v742_v46 = vsub.f32 %v1166_v6, %v726_v39  ;;  %v707_v4 = vmul.f32 0.6931472, %v993_v40  ;;  %1002 = vlog2.f32 %v685_v45  ;;  %v679_v48 = vpop.xlane.xlu0 %678 }
 0x3dc   :  { %761 = vst [vmem:[#allocation2 + $0x18] sm:$0xff] %v745_v35  ;;  %v727_v50 = vadd.f32 %v697_v44, %v1224_v43  ;;  %1004 = vlog2.f32 %v679_v48 }
 0x3dd   :  { %v995_v51 = vpop.eup %994  ;;  %758 = vst [vmem:[#allocation2] sm:$0xff] %v742_v46  ;;  %v732_v41 = vadd.f32 %v707_v4, %v1228_v47 }
 0x3de   :  { %v997_v52 = vpop.eup %996  ;;  %v743_v37 = vsub.f32 %v1172_v10, %v727_v50  ;;  %v709_v54 = vmul.f32 0.6931472, %v995_v51  ;;  %v681_v9 = vpop.xlane.xlu1 %680 }
 0x3df   :  { %v748_v56 = vsub.f32 %v1176_v12, %v732_v41  ;;  %v703_v57 = vmul.f32 0.6931472, %v997_v52  ;;  %1006 = vlog2.f32 %v681_v9  ;;  %v687_v6 = vpop.xlane.xlu0 %686 }
 0x3e0   :  { %759 = vst [vmem:[#allocation2 + $0x8] sm:$0xff] %v743_v37  ;;  %v733_v58 = vadd.f32 %v709_v54, %v1232_v49  ;;  %1008 = vlog2.f32 %v687_v6 }
 0x3e1   :  { %v999_v43 = vpop.eup %998  ;;  %764 = vst [vmem:[#allocation2 + $0x30] sm:$0xff] %v748_v56  ;;  %v730_v59 = vadd.f32 %v703_v57, %v1236_v53 }
 0x3e2   :  { %v1001_v61 = vpop.eup %1000  ;;  %v749_v47 = vsub.f32 %v1178_v15, %v733_v58  ;;  %v705_v62 = vmul.f32 0.6931472, %v999_v43  ;;  %v689_v10 = vpop.xlane.xlu1 %688 }
 0x3e3   :  { %v746_v0 = vsub.f32 %v1182_v17, %v730_v59  ;;  %v715_v1 = vmul.f32 0.6931472, %v1001_v61  ;;  %1010 = vlog2.f32 %v689_v10  ;;  %v691_v12 = vpop.xlane.xlu0 %690 }
 0x3e4   :  { %765 = vst [vmem:[#allocation2 + $0x38] sm:$0xff] %v749_v47  ;;  %v731_v2 = vadd.f32 %v705_v62, %v1240_v55  ;;  %1012 = vlog2.f32 %v691_v12 }
 0x3e5   :  { %v1003_v49 = vpop.eup %1002  ;;  %762 = vst [vmem:[#allocation2 + $0x20] sm:$0xff] %v746_v0  ;;  %v736_v3 = vadd.f32 %v715_v1, %v1244_v60 }
 0x3e6   :  { %v1005_v7 = vpop.eup %1004  ;;  %v747_v53 = vsub.f32 %v1184_v18, %v731_v2  ;;  %v717_v11 = vmul.f32 0.6931472, %v1003_v49  ;;  %v693_v15 = vpop.xlane.xlu1 %692 }
 0x3e7   :  { %v752_v13 = vsub.f32 %v1187_v20, %v736_v3  ;;  %v711_v14 = vmul.f32 0.6931472, %v1005_v7  ;;  %1014 = vlog2.f32 %v693_v15 }
 0x3e8   :  { %763 = vst [vmem:[#allocation2 + $0x28] sm:$0xff] %v747_v53  ;;  %v737_v17 = vadd.f32 %v717_v11, %v1248_v63 }
 0x3e9   :  { %v1007_v16 = vpop.eup %1006  ;;  %768 = vst [vmem:[#allocation2 + $0x50] sm:$0xff] %v752_v13  ;;  %v734_v55 = vadd.f32 %v711_v14, %v1252_v5 }
 0x3ea   :  { %v1009_v19 = vpop.eup %1008  ;;  %v753_v22 = vsub.f32 %v1190_v23, %v737_v17  ;;  %v713_v60 = vmul.f32 0.6931472, %v1007_v16 }
 0x3eb   :  { %v750_v24 = vsub.f32 %v1194_v25, %v734_v55  ;;  %v719_v18 = vmul.f32 0.6931472, %v1009_v19 }
 0x3ec   :  { %769 = vst [vmem:[#allocation2 + $0x58] sm:$0xff] %v753_v22  ;;  %v735_v28 = vadd.f32 %v713_v60, %v1256_v8 }
 0x3ed   :  { %v1011_v20 = vpop.eup %1010  ;;  %766 = vst [vmem:[#allocation2 + $0x40] sm:$0xff] %v750_v24  ;;  %v738_v30 = vadd.f32 %v719_v18, %v1260_v21 }
 0x3ee   :  { %v1013_v31 = vpop.eup %1012  ;;  %v751_v63 = vsub.f32 %v1196_v26, %v735_v28  ;;  %v721_v38 = vmul.f32 0.6931472, %v1011_v20 }
 0x3ef   :  { %v754_v5 = vsub.f32 %v1200_v29, %v738_v30  ;;  %v723_v39 = vmul.f32 0.6931472, %v1013_v31 }
 0x3f0   :  { %767 = vst [vmem:[#allocation2 + $0x48] sm:$0xff] %v751_v63  ;;  %v739_v23 = vadd.f32 %v721_v38, %v1264_v27 }
 0x3f1   :  { %v1015_v40 = vpop.eup %1014  ;;  %770 = vst [vmem:[#allocation2 + $0x60] sm:$0xff] %v754_v5  ;;  %v740_v25 = vadd.f32 %v723_v39, %v1268_v36 }
 0x3f2   :  { %v755_v8 = vsub.f32 %v1202_v32, %v739_v23  ;;  %v725_v35 = vmul.f32 0.6931472, %v1015_v40 }
 0x3f3   :  { %v756_v44 = vsub.f32 %v1205_v33, %v740_v25 }
 0x3f4   :  { %771 = vst [vmem:[#allocation2 + $0x68] sm:$0xff] %v755_v8  ;;  %v741_v26 = vadd.f32 %v725_v35, %v1272_v42 }
 0x3f5   :  { %772 = vst [vmem:[#allocation2 + $0x70] sm:$0xff] %v756_v44 }
 0x3f6   :  { %v757_v29 = vsub.f32 %v1208_v34, %v741_v26 }
 0x3f8   :  { %773 = vst [vmem:[#allocation2 + $0x78] sm:$0xff] %v757_v29 }
 0x3f9   :  { %1027 = shalt.err (!%p1024_p4)
}
 0x3fa   :  { %s1028_s13 = scalar_lea.hbm %s1327_s7, 2048 }
 0x3fb   :  { %p1029_p5 = scmp.ne.s32.totalorder %s1327_s7, %s1028_s13  ;;  %p1032_p6 = scmp.lt.u32.totalorder %s1028_s13, %s1327_s7 }
 0x3fd   :  { %p1034_p7 = pnand %p1032_p6, %p1029_p5 }
 0x3ff   :  { %1037 = shalt.err (!%p1034_p7)
}
 0x400   :  { %s1041_s18 = smov 128   ;;  %s1042_s19 = smov 8  }
 0x401   :  { %785 = dma.vmem_to_hbm [thread:$0]  %s780_s10, 2048, %s1327_s7, [#allocation3], %s1041_s18, %s1041_s18, %s1042_s19  }
 0x402   :  { %1038 = dma.done.wait [#allocation3], 2048  }
 0x403   :  { %1039 = vsyncadd [#allocation3], 4294965248 }
 0x404   :  { %789 = vsyncpa [#allocation3], 1 }

</bundles_post_ra>
